<compile_context>
chip_gen: v5e
topology: v5e:2x2
jax: 0.10.0
libtpu: 0.0.40
codegen_flags: <defaults>
</compile_context>

<pallas_src>
import jax
import jax.numpy as jnp
from jax.experimental import pallas as pl
from jax.experimental.pallas import tpu as pltpu


def learner_kernel(x_ref, w1_ref, b1_ref, w2_ref, b2_ref, w3_ref, b3_ref, o_ref):
    # fc1 + ReLU  (cast x to the weight dtype so bf16 weights hit the fast MXU path;
    # accumulation is fp32 via preferred_element_type, bias/ReLU stay fp32 -> v5e-safe)
    x = x_ref[...].astype(w1_ref.dtype)
    h1 = jnp.dot(x, w1_ref[...], preferred_element_type=jnp.float32)
    h1 = jnp.maximum(h1 + b1_ref[...].astype(jnp.float32), 0.0)
    # fc2 + ReLU
    h1 = h1.astype(w2_ref.dtype)
    h2 = jnp.dot(h1, w2_ref[...], preferred_element_type=jnp.float32)
    h2 = jnp.maximum(h2 + b2_ref[...].astype(jnp.float32), 0.0)
    # fc3 (no activation; the nn.Softmax in __init__ is never applied in forward)
    h2 = h2.astype(w3_ref.dtype)
    out = jnp.dot(h2, w3_ref[...], preferred_element_type=jnp.float32)
    o_ref[...] = (out + b3_ref[...].astype(jnp.float32)).astype(o_ref.dtype)


def _round_up(a, m):
    return -(-a // m) * m


def prepare_params(params, *, dtype=None, pad_hidden=True):
    """One-time parameter prep (keep OUT of the per-call hot path).

    * Pads hidden dims up to multiples of 128 with zero rows/cols. Padded hidden
      units are exactly 0 after ReLU and contribute nothing downstream, so the
      forward result is unchanged.
    * Optionally casts params to bf16 (recommended on v5e/v6e/v7x: halves resident
      weight VMEM + DMA and hits the bf16-native MXU; the kernel still accumulates
      in fp32). Do NOT int8-quantize: v7x's MXU has no int path.
    """
    w1, b1, w2, b2, w3, b3 = params
    if pad_hidden:
        h1, h2 = w1.shape[1], w2.shape[1]
        h1p, h2p = _round_up(h1, 128), _round_up(h2, 128)
        if h1p != h1:
            w1 = jnp.pad(w1, ((0, 0), (0, h1p - h1)))
            b1 = jnp.pad(b1, ((0, 0), (0, h1p - h1)))
            w2 = jnp.pad(w2, ((0, h1p - h1), (0, 0)))
        if h2p != h2:
            w2 = jnp.pad(w2, ((0, 0), (0, h2p - h2)))
            b2 = jnp.pad(b2, ((0, 0), (0, h2p - h2)))
            w3 = jnp.pad(w3, ((0, h2p - h2), (0, 0)))
    prepared = (w1, b1, w2, b2, w3, b3)
    if dtype is not None:
        prepared = jax.tree_util.tree_map(lambda p: p.astype(dtype), prepared)
    return prepared


def learner_forward(x, params, *, block_b=1024):
    """Fused MLP forward (fc1->ReLU->fc2->ReLU->fc3) with a batch grid.

    Weights/biases stay VMEM-resident across grid steps (constant index maps ->
    DMA'd once); x/out tiles are auto-pipelined over the batch axis, which is
    marked "parallel" so v7x's two TensorCores split the grid. `params` should
    come from prepare_params() so padding/casting happens once, out of band.
    """
    w1, b1, w2, b2, w3, b3 = params
    B, dim_obs = x.shape
    dim_action = w3.shape[1]
    hid1, hid2 = w1.shape[1], w2.shape[1]

    # Batch tiling: as few, as large, grid steps as possible (per-step overhead
    # ~0.35us dominates this kernel), but force an even grid length when the
    # batch is big enough so both v7x TensorCores get work.
    nb = max(1, -(-B // block_b))
    if (nb % 2) == 1 and B >= 256:
        nb += 1
    bb = _round_up(-(-B // nb), 8)
    B_pad = nb * bb
    if B_pad != B:
        x = jnp.pad(x, ((0, B_pad - B), (0, 0)))

    # Weights/biases: full-array blocks, same block every grid step -> VMEM-resident.
    # (On v7x one could add pipeline_mode=pl.Buffered(1) to drop the second ~550 KB
    #  buffer; left at the default double-buffering for portability.)
    def resident(a):
        return pl.BlockSpec(a.shape, lambda i: tuple(0 for _ in a.shape))

    # Advisory cost hint so XLA can schedule/overlap around this us-scale call.
    param_bytes = sum(int(p.size) * jnp.dtype(p.dtype).itemsize for p in params)
    flops = 2 * B_pad * (dim_obs * hid1 + hid1 * hid2 + hid2 * dim_action)
    bytes_accessed = (B_pad * dim_obs * x.dtype.itemsize
                      + param_bytes
                      + B_pad * dim_action * 4)
    cost = pl.CostEstimate(flops=flops, transcendentals=0,
                           bytes_accessed=bytes_accessed)

    # Only override the scoped-VMEM budget when a very large batch tile needs it
    # (v5e default is 16 MiB); the default block_b stays well under that.
    vmem_est = (2 * bb * dim_obs * x.dtype.itemsize   # double-buffered x tiles
                + 2 * bb * dim_action * 4             # double-buffered out tiles
                + 2 * param_bytes                     # resident (double-buffered) params
                + bb * (hid1 + hid2) * 4)             # fp32 intermediates
    vmem_limit = None
    if vmem_est > 16 * 1024 * 1024:
        vmem_limit = min(int(vmem_est * 3 // 2), 64 * 1024 * 1024)

    out = pl.pallas_call(
        learner_kernel,
        out_shape=jax.ShapeDtypeStruct((B_pad, dim_action), jnp.float32),
        grid_spec=pltpu.PrefetchScalarGridSpec(
            num_scalar_prefetch=0,
            grid=(nb,),
            in_specs=[
                pl.BlockSpec((bb, dim_obs), lambda i: (i, 0)),   # x: tiled over batch
                resident(w1), resident(b1),
                resident(w2), resident(b2),
                resident(w3), resident(b3),
            ],
            out_specs=pl.BlockSpec((bb, dim_action), lambda i: (i, 0)),
        ),
        compiler_params=pltpu.CompilerParams(
            dimension_semantics=("parallel",),
            vmem_limit_bytes=vmem_limit,
        ),
        cost_estimate=cost,
    )(x, w1, b1, w2, b2, w3, b3)

    # No output-column padding anymore; only slice if batch rows were padded.
    return out if B_pad == B else out[:B]


def init_params(key, dim_obs, dim_action, hidden1=400, hidden2=300, dtype=jnp.float32):
    """Deterministic init mimicking nn.Linear's default U(-1/sqrt(fan_in), +1/sqrt(fan_in))."""
    ks = jax.random.split(key, 6)

    def linear(kw, kb, fan_in, fan_out):
        bound = 1.0 / jnp.sqrt(jnp.float32(fan_in))
        w = jax.random.uniform(kw, (fan_in, fan_out), jnp.float32, -bound, bound)
        b = jax.random.uniform(kb, (1, fan_out), jnp.float32, -bound, bound)
        return w.astype(dtype), b.astype(dtype)

    w1, b1 = linear(ks[0], ks[1], dim_obs, hidden1)
    w2, b2 = linear(ks[2], ks[3], hidden1, hidden2)
    w3, b3 = linear(ks[4], ks[5], hidden2, dim_action)
    return (w1, b1, w2, b2, w3, b3)


def _ref_forward(x, params):
    w1, b1, w2, b2, w3, b3 = params
    h = jnp.maximum(x @ w1 + b1, 0.0)
    h = jnp.maximum(h @ w2 + b2, 0.0)
    return h @ w3 + b3


if __name__ == "__main__":
    key = jax.random.PRNGKey(0)
    kx, kx2, kp = jax.random.split(key, 3)

    dim_obs, dim_action = 32, 16
    raw_params = init_params(kp, dim_obs, dim_action, hidden1=400, hidden2=300)

    # One-time prep (outside the hot path): hidden dims padded 400->512, 300->384.
    params_f32 = prepare_params(raw_params)                        # fp32 path
    params_bf16 = prepare_params(raw_params, dtype=jnp.bfloat16)   # recommended default

    # --- Small batch: single grid step ---
    x_small = jax.random.normal(kx, (8, dim_obs), dtype=jnp.float32)
    out_small = jax.block_until_ready(learner_forward(x_small, params_f32))
    assert out_small.shape == (8, dim_action)
    assert jnp.allclose(out_small, _ref_forward(x_small, raw_params), atol=1e-4, rtol=1e-4)

    # --- Larger batch: even 2-step grid (v7x 2 TCs), weights VMEM-resident across steps ---
    x_big = jax.random.normal(kx2, (512, dim_obs), dtype=jnp.float32)
    out_big = jax.block_until_ready(learner_forward(x_big, params_f32))
    assert out_big.shape == (512, dim_action)
    assert jnp.allclose(out_big, _ref_forward(x_big, raw_params), atol=1e-4, rtol=1e-4)

    # --- bf16 weight path (bf16-native MXU on v5e/v6e/v7x; fp32 accumulation) ---
    out_bf16 = jax.block_until_ready(learner_forward(x_big, params_bf16))
    ref_params_bf16 = jax.tree_util.tree_map(
        lambda p: p.astype(jnp.bfloat16).astype(jnp.float32), raw_params)
    ref_bf16 = _ref_forward(x_big.astype(jnp.bfloat16).astype(jnp.float32), ref_params_bf16)
    assert out_bf16.shape == (512, dim_action)
    assert jnp.allclose(out_bf16, ref_bf16, atol=1e-1, rtol=5e-2)

    print("KERNEL_OK")
</pallas_src>

<mosaic_0001>
module attributes {stable_mosaic.version = 11 : i64} {
  func.func @learner_kernel(%arg0: i32, %arg1: memref<8x32xf32, #tpu.memory_space<vmem>>, %arg2: memref<32x512xf32, #tpu.memory_space<vmem>>, %arg3: memref<1x512xf32, #tpu.memory_space<vmem>>, %arg4: memref<512x384xf32, #tpu.memory_space<vmem>>, %arg5: memref<1x384xf32, #tpu.memory_space<vmem>>, %arg6: memref<384x16xf32, #tpu.memory_space<vmem>>, %arg7: memref<1x16xf32, #tpu.memory_space<vmem>>, %arg8: memref<8x16xf32, #tpu.memory_space<vmem>>) attributes {dimension_semantics = [#tpu.dimension_semantics<parallel>], iteration_bounds = array<i64: 1>, scalar_prefetch = 0 : i64, scratch_operands = 0 : i64, tpu.core_type = #tpu.core_type<tc>, window_params = [{transform_indices = @transform_0, window_bounds = array<i64: 8, 32>}, {pipeline_mode = #tpu.pipeline_mode<synchronous>, transform_indices = @transform_1, window_bounds = array<i64: 32, 512>}, {pipeline_mode = #tpu.pipeline_mode<synchronous>, transform_indices = @transform_2, window_bounds = array<i64: 1, 512>}, {pipeline_mode = #tpu.pipeline_mode<synchronous>, transform_indices = @transform_3, window_bounds = array<i64: 512, 384>}, {pipeline_mode = #tpu.pipeline_mode<synchronous>, transform_indices = @transform_4, window_bounds = array<i64: 1, 384>}, {pipeline_mode = #tpu.pipeline_mode<synchronous>, transform_indices = @transform_5, window_bounds = array<i64: 384, 16>}, {pipeline_mode = #tpu.pipeline_mode<synchronous>, transform_indices = @transform_6, window_bounds = array<i64: 1, 16>}, {transform_indices = @transform_7, window_bounds = array<i64: 8, 16>}]} {
    %c0 = arith.constant 0 : index
    %c0_0 = arith.constant 0 : index
    %0 = vector.load %arg1[%c0, %c0_0] : memref<8x32xf32, #tpu.memory_space<vmem>>, vector<8x32xf32>
    %c0_1 = arith.constant 0 : index
    %c0_2 = arith.constant 0 : index
    %1 = vector.load %arg2[%c0_1, %c0_2] : memref<32x512xf32, #tpu.memory_space<vmem>>, vector<32x512xf32>
    %cst = arith.constant dense<0.000000e+00> : vector<8x512xf32>
    %2 = tpu.matmul %0, %1, %cst {dimension_numbers = #tpu.dot_dimension_numbers<[1], [0], [0], [1], [0, 0, 1, 1], [], []>} : vector<8x32xf32>, vector<32x512xf32>, vector<8x512xf32> -> vector<8x512xf32>
    %c0_3 = arith.constant 0 : index
    %c0_4 = arith.constant 0 : index
    %3 = vector.load %arg3[%c0_3, %c0_4] : memref<1x512xf32, #tpu.memory_space<vmem>>, vector<1x512xf32>
    %4 = vector.broadcast %3 : vector<1x512xf32> to vector<8x512xf32>
    %5 = arith.addf %2, %4 : vector<8x512xf32>
    %cst_5 = arith.constant 0.000000e+00 : f32
    %6 = vector.broadcast %cst_5 : f32 to vector<8x512xf32>
    %7 = arith.maximumf %5, %6 : vector<8x512xf32>
    %c0_6 = arith.constant 0 : index
    %c0_7 = arith.constant 0 : index
    %8 = vector.load %arg4[%c0_6, %c0_7] : memref<512x384xf32, #tpu.memory_space<vmem>>, vector<512x384xf32>
    %cst_8 = arith.constant dense<0.000000e+00> : vector<8x384xf32>
    %9 = tpu.matmul %7, %8, %cst_8 {dimension_numbers = #tpu.dot_dimension_numbers<[1], [0], [0], [1], [0, 0, 1, 1], [], []>} : vector<8x512xf32>, vector<512x384xf32>, vector<8x384xf32> -> vector<8x384xf32>
    %c0_9 = arith.constant 0 : index
    %c0_10 = arith.constant 0 : index
    %10 = vector.load %arg5[%c0_9, %c0_10] : memref<1x384xf32, #tpu.memory_space<vmem>>, vector<1x384xf32>
    %11 = vector.broadcast %10 : vector<1x384xf32> to vector<8x384xf32>
    %12 = arith.addf %9, %11 : vector<8x384xf32>
    %cst_11 = arith.constant 0.000000e+00 : f32
    %13 = vector.broadcast %cst_11 : f32 to vector<8x384xf32>
    %14 = arith.maximumf %12, %13 : vector<8x384xf32>
    %c0_12 = arith.constant 0 : index
    %c0_13 = arith.constant 0 : index
    %15 = vector.load %arg6[%c0_12, %c0_13] : memref<384x16xf32, #tpu.memory_space<vmem>>, vector<384x16xf32>
    %cst_14 = arith.constant dense<0.000000e+00> : vector<8x16xf32>
    %16 = tpu.matmul %14, %15, %cst_14 {dimension_numbers = #tpu.dot_dimension_numbers<[1], [0], [0], [1], [0, 0, 1, 1], [], []>} : vector<8x384xf32>, vector<384x16xf32>, vector<8x16xf32> -> vector<8x16xf32>
    %c0_15 = arith.constant 0 : index
    %c0_16 = arith.constant 0 : index
    %17 = vector.load %arg7[%c0_15, %c0_16] : memref<1x16xf32, #tpu.memory_space<vmem>>, vector<1x16xf32>
    %18 = vector.broadcast %17 : vector<1x16xf32> to vector<8x16xf32>
    %19 = arith.addf %16, %18 : vector<8x16xf32>
    %c0_17 = arith.constant 0 : index
    %c0_18 = arith.constant 0 : index
    %20 = vector.load %arg8[%c0_17, %c0_18] : memref<8x16xf32, #tpu.memory_space<vmem>>, vector<8x16xf32>
    tpu.vector_store %arg8[%c0_17, %c0_18], %19 {strides = array<i32>} : memref<8x16xf32, #tpu.memory_space<vmem>>, vector<8x16xf32>,
    return
  }
  func.func @transform_0(%arg0: i32) -> (i32, i32) {
    %c0_i32 = arith.constant 0 : i32
    %c0_i32_0 = arith.constant 0 : i32
    return %arg0, %c0_i32 : i32, i32
  }
  func.func @transform_1(%arg0: i32) -> (i32, i32) {
    %c0_i32 = arith.constant 0 : i32
    %c0_i32_0 = arith.constant 0 : i32
    %c0_i32_1 = arith.constant 0 : i32
    return %c0_i32, %c0_i32_0 : i32, i32
  }
  func.func @transform_2(%arg0: i32) -> (i32, i32) {
    %c0_i32 = arith.constant 0 : i32
    %c0_i32_0 = arith.constant 0 : i32
    %c0_i32_1 = arith.constant 0 : i32
    return %c0_i32, %c0_i32_0 : i32, i32
  }
  func.func @transform_3(%arg0: i32) -> (i32, i32) {
    %c0_i32 = arith.constant 0 : i32
    %c0_i32_0 = arith.constant 0 : i32
    %c0_i32_1 = arith.constant 0 : i32
    return %c0_i32, %c0_i32_0 : i32, i32
  }
  func.func @transform_4(%arg0: i32) -> (i32, i32) {
    %c0_i32 = arith.constant 0 : i32
    %c0_i32_0 = arith.constant 0 : i32
    %c0_i32_1 = arith.constant 0 : i32
    return %c0_i32, %c0_i32_0 : i32, i32
  }
  func.func @transform_5(%arg0: i32) -> (i32, i32) {
    %c0_i32 = arith.constant 0 : i32
    %c0_i32_0 = arith.constant 0 : i32
    %c0_i32_1 = arith.constant 0 : i32
    return %c0_i32, %c0_i32_0 : i32, i32
  }
  func.func @transform_6(%arg0: i32) -> (i32, i32) {
    %c0_i32 = arith.constant 0 : i32
    %c0_i32_0 = arith.constant 0 : i32
    %c0_i32_1 = arith.constant 0 : i32
    return %c0_i32, %c0_i32_0 : i32, i32
  }
  func.func @transform_7(%arg0: i32) -> (i32, i32) {
    %c0_i32 = arith.constant 0 : i32
    %c0_i32_0 = arith.constant 0 : i32
    return %arg0, %c0_i32 : i32, i32
  }
}

</mosaic_0001>

<bundles_post_ra>
// kernel: tpu_custom_call.1
= control target key start
LH: loop header
LB: loop body
LE: loop exit
PB: predicated region body
PF: predicated region fallthrough
CT: control target
= control target key end

     0   :  { %12 = vsyncpa [#allocation3], 0  ;;  %s1083_s0 = inlined_call_operand.vmem [shape: f32[8,32], index: 0, kind: input, shape index: {}]   ;;  %s1084_s1 = inlined_call_operand.vmem [shape: f32[32,512], index: 1, kind: input, shape index: {}]   ;;  %s1085_s2 = inlined_call_operand.vmem [shape: f32[1,512], index: 2, kind: input, shape index: {}]   ;;  %s1086_s3 = inlined_call_operand.hbm [shape: f32[512,384], index: 3, kind: input, shape index: {}]   ;;  %s1087_s4 = inlined_call_operand.vmem [shape: f32[1,384], index: 4, kind: input, shape index: {}]   ;;  %s1088_s5 = inlined_call_operand.vmem [shape: f32[384,16], index: 5, kind: input, shape index: {}]   ;;  %s1089_s6 = inlined_call_operand.vmem [shape: f32[1,16], index: 6, kind: input, shape index: {}]   ;;  %s1090_s7 = inlined_call_operand.hbm [shape: f32[8,16], index: 7, kind: output, shape index: {}]  }
   0x1   :  { %13 = vsyncpa [#allocation4], 0  ;;  %s24_s26 = sshll.u32 %s1086_s3, 4  ;;  %s793_s27 = smov [#allocation2]   ;;  %s25_s26 = int_to_ptr.hbm [resolvable:$true] %s24_s26 }
   0x2   :  { %s26_s28 = sshll.u32 %s793_s27, 4  ;;  %s794_s29 = smov 384   ;;  %s27_s28 = int_to_ptr.vmem [resolvable:$true] %s26_s28 }
   0x3   :  { %s795_s30 = smov 24  }
   0x4   :  { %32 = dma.hbm_to_vmem [thread:$0]  %s25_s26, 24576, %s27_s28, [#allocation3], %s794_s29, %s794_s29, %s795_s30  }
   0x5   :  { %789 = dma.done.wait [#allocation3], 24576  }
   0x6   :  { %790 = vsyncadd [#allocation3], 4294942720  ;;  %v56_v0 = vld [vmem:[%s1084_s1 + $0x60] sm:$0xff]  ;;  %vm70_vm0 = vcmask 261120   ;;  %v203_v5 = vld [vmem:[#allocation2 + $0x168] sm:$0xff]  ;;  %s796_s9 = smov [#allocation5]  }
   0x7   :  { %v52_v1 = vld [vmem:[%s1084_s1 + $0x40] sm:$0xff]  ;;  %86 = vmatpush.msra.mxu3 %v56_v0  ;;  %v57_v6 = vld [vmem:[%s1084_s1 + $0x68] sm:$0xff]  ;;  %358 = vmatpush.msra.mxu0 %v203_v5  ;;  %v200_v7 = vld [vmem:[#allocation2 + $0x150] sm:$0xff]  ;;  %s720_s10 = sshll.u32 %s796_s9, 4  ;;  %s722_s3 = sshll.u32 %s1090_s7, 4  ;;  %vm713_vm1 = vcmask 130048   ;;  %s721_s10 = int_to_ptr.vmem [resolvable:$true] %s720_s10  ;;  %s723_s3 = int_to_ptr.hbm [resolvable:$true] %s722_s3 }
   0x8   :  { %v48_v2 = vld [vmem:[%s1084_s1 + $0x20] sm:$0xff]  ;;  %v197_v8 = vld [vmem:[#allocation2 + $0x138] sm:$0xff]  ;;  %v251_v9 = vld [vmem:[#allocation2 + $0x2e8] sm:$0xff] }
   0x9   :  { %87 = vmatpush.msra.mxu3 %v52_v1  ;;  %v44_v3 = vld [vmem:[%s1084_s1] sm:$0xff]  ;;  %v53_v10 = vld [vmem:[%s1084_s1 + $0x48] sm:$0xff]  ;;  %359 = vmatpush.msra.mxu0 %v200_v7  ;;  %v248_v11 = vld [vmem:[#allocation2 + $0x2d0] sm:$0xff] }
   0xa   :  { %v855_v4 = vld [vmem:[%s1083_s0] sm:$0xff]  ;;  %378 = vmatpush.msra.mxu1 %v251_v9  ;;  %v49_v13 = vld [vmem:[%s1084_s1 + $0x28] sm:$0xff]  ;;  %v245_v14 = vld [vmem:[#allocation2 + $0x2b8] sm:$0xff] }
   0xb   :  { %88 = vmatpush.msra.mxu3 %v48_v2  ;;  %v194_v12 = vld [vmem:[#allocation2 + $0x120] sm:$0xff]  ;;  %360 = vmatpush.msra.mxu0 %v197_v8  ;;  %v299_v15 = vld [vmem:[#allocation2 + $0x468] sm:$0xff]  ;;  %v296_v17 = vld [vmem:[#allocation2 + $0x450] sm:$0xff] }
   0xc   :  { %v191_v16 = vld [vmem:[#allocation2 + $0x108] sm:$0xff]  ;;  %379 = vmatpush.msra.mxu1 %v248_v11  ;;  %v242_v19 = vld [vmem:[#allocation2 + $0x2a0] sm:$0xff]  ;;  %398 = vmatpush.msra.mxu2 %v299_v15  ;;  %v188_v20 = vld [vmem:[#allocation2 + $0xf0] sm:$0xff] }
   0xd   :  { %89 = vmatpush.msra.mxu3 %v44_v3  ;;  %v45_v18 = vld [vmem:[%s1084_s1 + $0x8] sm:$0xff]  ;;  %361 = vmatpush.msra.mxu0 %v194_v12  ;;  %v58_v21 = vld [vmem:[%s1084_s1 + $0x70] sm:$0xff]  ;;  %v185_v23 = vld [vmem:[#allocation2 + $0xd8] sm:$0xff] }
   0xe   :  { %732 = vmatmul.msk.f32.vlgmr.msra.gmra.mxu3 %vm70_vm0, %v855_v4  ;;  %380 = vmatpush.msra.mxu1 %v245_v14  ;;  %v239_v22 = vld [vmem:[#allocation2 + $0x288] sm:$0xff]  ;;  %v293_v24 = vld [vmem:[#allocation2 + $0x438] sm:$0xff]  ;;  %v54_v25 = vld [vmem:[%s1084_s1 + $0x50] sm:$0xff] }
   0xf   :  { %106 = vmatpush.msrb.mxu3 %v57_v6  ;;  %362 = vmatpush.msra.mxu0 %v191_v16  ;;  %v236_v26 = vld [vmem:[#allocation2 + $0x270] sm:$0xff]  ;;  %v182_v27 = vld [vmem:[#allocation2 + $0xc0] sm:$0xff]  ;;  %v233_v30 = vld [vmem:[#allocation2 + $0x258] sm:$0xff] }
  0x10   :  { %399 = vmatpush.msra.mxu2 %v296_v17  ;;  %381 = vmatpush.msra.mxu1 %v242_v19  ;;  %v290_v28 = vld [vmem:[#allocation2 + $0x420] sm:$0xff]  ;;  %v50_v29 = vld [vmem:[%s1084_s1 + $0x30] sm:$0xff]  ;;  %v179_v31 = vld [vmem:[#allocation2 + $0xa8] sm:$0xff] }
  0x11   :  { %107 = vmatpush.msrb.mxu3 %v53_v10  ;;  %363 = vmatpush.msra.mxu0 %v188_v20  ;;  %v287_v32 = vld [vmem:[#allocation2 + $0x408] sm:$0xff]  ;;  %v46_v33 = vld [vmem:[%s1084_s1 + $0x10] sm:$0xff]  ;;  %v230_v34 = vld [vmem:[#allocation2 + $0x240] sm:$0xff] }
  0x12   :  { %382 = vmatpush.msra.mxu1 %v239_v22  ;;  %400 = vmatpush.msra.mxu2 %v293_v24  ;;  %v176_v35 = vld [vmem:[#allocation2 + $0x90] sm:$0xff]  ;;  %v59_v36 = vld [vmem:[%s1084_s1 + $0x78] sm:$0xff]  ;;  %v227_v37 = vld [vmem:[#allocation2 + $0x228] sm:$0xff] }
  0x13   :  { %108 = vmatpush.msrb.mxu3 %v49_v13  ;;  %364 = vmatpush.msra.mxu0 %v185_v23  ;;  %v173_v38 = vld [vmem:[#allocation2 + $0x78] sm:$0xff]  ;;  %v284_v39 = vld [vmem:[#allocation2 + $0x3f0] sm:$0xff]  ;;  %v170_v42 = vld [vmem:[#allocation2 + $0x60] sm:$0xff] }
  0x14   :  { %383 = vmatpush.msra.mxu1 %v236_v26  ;;  %401 = vmatpush.msra.mxu2 %v290_v28  ;;  %v55_v40 = vld [vmem:[%s1084_s1 + $0x58] sm:$0xff]  ;;  %v224_v41 = vld [vmem:[#allocation2 + $0x210] sm:$0xff]  ;;  %v167_v46 = vld [vmem:[#allocation2 + $0x48] sm:$0xff] }
  0x15   :  { %109 = vmatpush.msrb.mxu3 %v45_v18  ;;  %365 = vmatpush.msra.mxu0 %v182_v27  ;;  %v281_v43 = vld [vmem:[#allocation2 + $0x3d8] sm:$0xff]  ;;  %v278_v47 = vld [vmem:[#allocation2 + $0x3c0] sm:$0xff]  ;;  %v164_v50 = vld [vmem:[#allocation2 + $0x30] sm:$0xff] }
  0x16   :  { %733 = vmatmul.msk.f32.vlgmr.msrb.gmra.mxu3 %vm70_vm0, %v855_v4  ;;  %384 = vmatpush.msra.mxu1 %v233_v30  ;;  %v51_v44 = vld [vmem:[%s1084_s1 + $0x38] sm:$0xff]  ;;  %v218_v49 = vld [vmem:[#allocation2 + $0x1e0] sm:$0xff]  ;;  %v347_v51 = vld [vmem:[#allocation2 + $0x5e8] sm:$0xff] }
  0x17   :  { %126 = vmatpush.msra.mxu3 %v58_v21  ;;  %366 = vmatpush.msra.mxu0 %v179_v31  ;;  %v221_v45 = vld [vmem:[#allocation2 + $0x1f8] sm:$0xff]  ;;  %v215_v52 = vld [vmem:[#allocation2 + $0x1c8] sm:$0xff]  ;;  %v344_v55 = vld [vmem:[#allocation2 + $0x5d0] sm:$0xff] }
  0x18   :  { %402 = vmatpush.msra.mxu2 %v287_v32  ;;  %385 = vmatpush.msra.mxu1 %v230_v34  ;;  %v47_v48 = vld [vmem:[%s1084_s1 + $0x18] sm:$0xff]  ;;  %v275_v54 = vld [vmem:[#allocation2 + $0x3a8] sm:$0xff]  ;;  %v212_v56 = vld [vmem:[#allocation2 + $0x1b0] sm:$0xff] }
  0x19   :  { %127 = vmatpush.msra.mxu3 %v54_v25  ;;  %367 = vmatpush.msra.mxu0 %v176_v35  ;;  %v161_v53 = vld [vmem:[#allocation2 + $0x18] sm:$0xff]  ;;  %v158_v57 = vld [vmem:[#allocation2] sm:$0xff]  ;;  %v272_v58 = vld [vmem:[#allocation2 + $0x390] sm:$0xff] }
  0x1a   :  { %386 = vmatpush.msra.mxu1 %v227_v37  ;;  %403 = vmatpush.msra.mxu2 %v284_v39  ;;  %v341_v59 = vld [vmem:[#allocation2 + $0x5b8] sm:$0xff]  ;;  %v204_v60 = vld [vmem:[#allocation2 + $0x170] sm:$0xff]  ;;  %v338_v63 = vld [vmem:[#allocation2 + $0x5a0] sm:$0xff] }
  0x1b   :  { %128 = vmatpush.msra.mxu3 %v50_v29  ;;  %368 = vmatpush.msra.mxu0 %v173_v38  ;;  %v209_v61 = vld [vmem:[#allocation2 + $0x198] sm:$0xff]  ;;  %v206_v1 = vld [vmem:[#allocation2 + $0x180] sm:$0xff]  ;;  %v335_v3 = vld [vmem:[#allocation2 + $0x588] sm:$0xff] }
  0x1c   :  { %387 = vmatpush.msra.mxu1 %v224_v41  ;;  %404 = vmatpush.msra.mxu2 %v281_v43  ;;  %v269_v62 = vld [vmem:[#allocation2 + $0x378] sm:$0xff]  ;;  %v266_v2 = vld [vmem:[#allocation2 + $0x360] sm:$0xff]  ;;  %v252_v5 = vld [vmem:[#allocation2 + $0x2f0] sm:$0xff] }
  0x1d   :  { %129 = vmatpush.msra.mxu3 %v46_v33  ;;  %369 = vmatpush.msra.mxu0 %v170_v42  ;;  %v201_v0 = vld [vmem:[#allocation2 + $0x158] sm:$0xff]  ;;  %v263_v6 = vld [vmem:[#allocation2 + $0x348] sm:$0xff]  ;;  %v332_v7 = vld [vmem:[#allocation2 + $0x570] sm:$0xff] }
  0x1e   :  { %734 = vmatmul.msk.f32.vlgmr.msra.gmra.mxu3 %vm70_vm0, %v855_v4  ;;  %388 = vmatpush.msra.mxu1 %v221_v45  ;;  %v195_v8 = vld [vmem:[#allocation2 + $0x128] sm:$0xff]  ;;  %v249_v9 = vld [vmem:[#allocation2 + $0x2d8] sm:$0xff]  ;;  %v260_v10 = vld [vmem:[#allocation2 + $0x330] sm:$0xff] }
  0x1f   :  { %146 = vmatpush.msrb.mxu3 %v59_v36  ;;  %370 = vmatpush.msra.mxu0 %v167_v46  ;;  %v329_v11 = vld [vmem:[#allocation2 + $0x558] sm:$0xff]  ;;  %v192_v12 = vld [vmem:[#allocation2 + $0x110] sm:$0xff]  ;;  %v246_v13 = vld [vmem:[#allocation2 + $0x2c0] sm:$0xff] }
  0x20   :  { %405 = vmatpush.msra.mxu2 %v278_v47  ;;  %389 = vmatpush.msra.mxu1 %v218_v49  ;;  %v257_v14 = vld [vmem:[#allocation2 + $0x318] sm:$0xff]  ;;  %v326_v15 = vld [vmem:[#allocation2 + $0x540] sm:$0xff]  ;;  %v243_v17 = vld [vmem:[#allocation2 + $0x2a8] sm:$0xff] }
  0x21   :  { %147 = vmatpush.msrb.mxu3 %v55_v40  ;;  %371 = vmatpush.msra.mxu0 %v164_v50  ;;  %v189_v16 = vld [vmem:[#allocation2 + $0xf8] sm:$0xff]  ;;  %v254_v18 = vld [vmem:[#allocation2 + $0x300] sm:$0xff]  ;;  %v323_v19 = vld [vmem:[#allocation2 + $0x528] sm:$0xff] }
  0x22   :  { %390 = vmatpush.msra.mxu1 %v215_v52  ;;  %406 = vmatpush.msra.mxu2 %v275_v54  ;;  %v186_v20 = vld [vmem:[#allocation2 + $0xe0] sm:$0xff]  ;;  %v240_v21 = vld [vmem:[#allocation2 + $0x290] sm:$0xff]  ;;  %v183_v24 = vld [vmem:[#allocation2 + $0xc8] sm:$0xff] }
  0x23   :  { %148 = vmatpush.msrb.mxu3 %v51_v44  ;;  %372 = vmatpush.msra.mxu0 %v161_v53  ;;  %v300_v22 = vld [vmem:[#allocation2 + $0x470] sm:$0xff]  ;;  %v237_v25 = vld [vmem:[#allocation2 + $0x278] sm:$0xff]  ;;  %v234_v29 = vld [vmem:[#allocation2 + $0x260] sm:$0xff] }
  0x24   :  { %391 = vmatpush.msra.mxu1 %v212_v56  ;;  %407 = vmatpush.msra.mxu2 %v272_v58  ;;  %v320_v23 = vld [vmem:[#allocation2 + $0x510] sm:$0xff]  ;;  %v297_v26 = vld [vmem:[#allocation2 + $0x458] sm:$0xff]  ;;  %v294_v30 = vld [vmem:[#allocation2 + $0x440] sm:$0xff] }
  0x25   :  { %149 = vmatpush.msrb.mxu3 %v47_v48  ;;  %373 = vmatpush.msra.mxu0 %v158_v57  ;;  %v317_v27 = vld [vmem:[#allocation2 + $0x4f8] sm:$0xff]  ;;  %v180_v28 = vld [vmem:[#allocation2 + $0xb0] sm:$0xff]  ;;  %v314_v31 = vld [vmem:[#allocation2 + $0x4e0] sm:$0xff] }
  0x26   :  { %735 = vmatmul.msk.f32.vlgmr.msrb.gmra.mxu3 %vm70_vm0, %v855_v4  ;;  %v198_v4 = vld [vmem:[#allocation2 + $0x140] sm:$0xff]  ;;  %392 = vmatpush.msra.mxu1 %v209_v61  ;;  %v177_v32 = vld [vmem:[#allocation2 + $0x98] sm:$0xff]  ;;  %v231_v33 = vld [vmem:[#allocation2 + $0x248] sm:$0xff] }
  0x27   :  { %418 = vmatpush.msra.mxu3 %v347_v51  ;;  %438 = vmatpush.msrb.mxu0 %v204_v60  ;;  %v291_v34 = vld [vmem:[#allocation2 + $0x428] sm:$0xff]  ;;  %v174_v36 = vld [vmem:[#allocation2 + $0x80] sm:$0xff]  ;;  %v228_v37 = vld [vmem:[#allocation2 + $0x230] sm:$0xff] }
  0x28   :  { %408 = vmatpush.msra.mxu2 %v269_v62  ;;  %393 = vmatpush.msra.mxu1 %v206_v1  ;;  %v311_v35 = vld [vmem:[#allocation2 + $0x4c8] sm:$0xff]  ;;  %v288_v38 = vld [vmem:[#allocation2 + $0x410] sm:$0xff]  ;;  %v305_v41 = vld [vmem:[#allocation2 + $0x498] sm:$0xff] }
  0x29   :  { %419 = vmatpush.msra.mxu3 %v344_v55  ;;  %439 = vmatpush.msrb.mxu0 %v201_v0  ;;  %v308_v39 = vld [vmem:[#allocation2 + $0x4b0] sm:$0xff]  ;;  %v171_v40 = vld [vmem:[#allocation2 + $0x68] sm:$0xff]  ;;  %v302_v43 = vld [vmem:[#allocation2 + $0x480] sm:$0xff] }
  0x2a   :  { %409 = vmatpush.msra.mxu2 %v266_v2  ;;  %458 = vmatpush.msrb.mxu1 %v252_v5  ;;  %v168_v42 = vld [vmem:[#allocation2 + $0x50] sm:$0xff]  ;;  %v165_v45 = vld [vmem:[#allocation2 + $0x38] sm:$0xff]  ;;  %v162_v49 = vld [vmem:[#allocation2 + $0x20] sm:$0xff] }
  0x2b   :  { %420 = vmatpush.msra.mxu3 %v341_v59  ;;  %440 = vmatpush.msrb.mxu0 %v198_v4  ;;  %v348_v44 = vld [vmem:[#allocation2 + $0x5f0] sm:$0xff]  ;;  %v225_v46 = vld [vmem:[#allocation2 + $0x218] sm:$0xff]  ;;  %v222_v50 = vld [vmem:[#allocation2 + $0x200] sm:$0xff] }
  0x2c   :  { %410 = vmatpush.msra.mxu2 %v263_v6  ;;  %459 = vmatpush.msrb.mxu1 %v249_v9  ;;  %v285_v47 = vld [vmem:[#allocation2 + $0x3f8] sm:$0xff]  ;;  %v282_v51 = vld [vmem:[#allocation2 + $0x3e0] sm:$0xff]  ;;  %v159_v53 = vld [vmem:[#allocation2 + $0x8] sm:$0xff] }
  0x2d   :  { %421 = vmatpush.msra.mxu3 %v338_v63  ;;  %441 = vmatpush.msrb.mxu0 %v195_v8  ;;  %v345_v48 = vld [vmem:[#allocation2 + $0x5d8] sm:$0xff]  ;;  %v342_v52 = vld [vmem:[#allocation2 + $0x5c0] sm:$0xff]  ;;  %v219_v54 = vld [vmem:[#allocation2 + $0x1e8] sm:$0xff] }
  0x2e   :  { %411 = vmatpush.msra.mxu2 %v260_v10  ;;  %460 = vmatpush.msrb.mxu1 %v246_v13  ;;  %v279_v55 = vld [vmem:[#allocation2 + $0x3c8] sm:$0xff]  ;;  %v216_v57 = vld [vmem:[#allocation2 + $0x1d0] sm:$0xff]  ;;  %v213_v60 = vld [vmem:[#allocation2 + $0x1b8] sm:$0xff] }
  0x2f   :  { %422 = vmatpush.msra.mxu3 %v335_v3  ;;  %442 = vmatpush.msrb.mxu0 %v192_v12  ;;  %v339_v56 = vld [vmem:[#allocation2 + $0x5a8] sm:$0xff]  ;;  %v276_v58 = vld [vmem:[#allocation2 + $0x3b0] sm:$0xff]  ;;  %v273_v61 = vld [vmem:[#allocation2 + $0x398] sm:$0xff] }
  0x30   :  { %412 = vmatpush.msra.mxu2 %v257_v14  ;;  %461 = vmatpush.msrb.mxu1 %v243_v17  ;;  %v336_v59 = vld [vmem:[#allocation2 + $0x590] sm:$0xff]  ;;  %v333_v62 = vld [vmem:[#allocation2 + $0x578] sm:$0xff]  ;;  %v210_v63 = vld [vmem:[#allocation2 + $0x1a0] sm:$0xff] }
  0x31   :  { %423 = vmatpush.msra.mxu3 %v332_v7  ;;  %443 = vmatpush.msrb.mxu0 %v189_v16  ;;  %v270_v0 = vld [vmem:[#allocation2 + $0x380] sm:$0xff]  ;;  %v207_v2 = vld [vmem:[#allocation2 + $0x188] sm:$0xff]  ;;  %v264_v5 = vld [vmem:[#allocation2 + $0x350] sm:$0xff] }
  0x32   :  { %413 = vmatpush.msra.mxu2 %v254_v18  ;;  %462 = vmatpush.msrb.mxu1 %v240_v21  ;;  %v330_v1 = vld [vmem:[#allocation2 + $0x560] sm:$0xff]  ;;  %v267_v3 = vld [vmem:[#allocation2 + $0x368] sm:$0xff]  ;;  %v324_v6 = vld [vmem:[#allocation2 + $0x530] sm:$0xff] }
  0x33   :  { %424 = vmatpush.msra.mxu3 %v329_v11  ;;  %444 = vmatpush.msrb.mxu0 %v186_v20  ;;  %v327_v4 = vld [vmem:[#allocation2 + $0x548] sm:$0xff]  ;;  %v261_v7 = vld [vmem:[#allocation2 + $0x338] sm:$0xff]  ;;  %v258_v9 = vld [vmem:[#allocation2 + $0x320] sm:$0xff] }
  0x34   :  { %478 = vmatpush.msrb.mxu2 %v300_v22  ;;  %463 = vmatpush.msrb.mxu1 %v237_v25  ;;  %v321_v8 = vld [vmem:[#allocation2 + $0x518] sm:$0xff]  ;;  %v318_v10 = vld [vmem:[#allocation2 + $0x500] sm:$0xff]  ;;  %v255_v11 = vld [vmem:[#allocation2 + $0x308] sm:$0xff] }
  0x35   :  { %425 = vmatpush.msra.mxu3 %v326_v15  ;;  %445 = vmatpush.msrb.mxu0 %v183_v24  ;;  %v315_v12 = vld [vmem:[#allocation2 + $0x4e8] sm:$0xff]  ;;  %v312_v13 = vld [vmem:[#allocation2 + $0x4d0] sm:$0xff]  ;;  %v309_v14 = vld [vmem:[#allocation2 + $0x4b8] sm:$0xff] }
  0x36   :  { %479 = vmatpush.msrb.mxu2 %v297_v26  ;;  %464 = vmatpush.msrb.mxu1 %v234_v29  ;;  %v904_v15 = vld [vmem:[%s1085_s2] sm:$0xf]  ;;  %v303_v18 = vld [vmem:[#allocation2 + $0x488] sm:$0xff]  ;;  %v205_v22 = vld [vmem:[#allocation2 + $0x178] sm:$0xff] }
  0x37   :  { %426 = vmatpush.msra.mxu3 %v323_v19  ;;  %446 = vmatpush.msrb.mxu0 %v180_v28  ;;  %v306_v16 = vld [vmem:[#allocation2 + $0x4a0] sm:$0xff]  ;;  %v62_v17 = vperm.slane %v904_v15, 0  ;;  %v63_v24 = vperm.slane %v904_v15, 1  ;;  %v199_v25 = vld [vmem:[#allocation2 + $0x148] sm:$0xff]  ;;  %v196_v28 = vld [vmem:[#allocation2 + $0x130] sm:$0xff] }
  0x38   :  { %480 = vmatpush.msrb.mxu2 %v294_v30  ;;  %465 = vmatpush.msrb.mxu1 %v231_v33  ;;  %v193_v30 = vld [vmem:[#allocation2 + $0x118] sm:$0xff]  ;;  %v250_v33 = vld [vmem:[#allocation2 + $0x2e0] sm:$0xff] }
  0x39   :  { %427 = vmatpush.msra.mxu3 %v320_v23  ;;  %447 = vmatpush.msrb.mxu0 %v177_v32  ;;  %v202_v23 = vld [vmem:[#allocation2 + $0x160] sm:$0xff] }
  0x3a   :  { %481 = vmatpush.msrb.mxu2 %v291_v34  ;;  %466 = vmatpush.msrb.mxu1 %v228_v37  ;;  %v190_v32 = vld [vmem:[#allocation2 + $0x100] sm:$0xff]  ;;  %v64_v34 = vperm.slane %v904_v15, 2 }
  0x3b   :  { %428 = vmatpush.msra.mxu3 %v317_v27  ;;  %448 = vmatpush.msrb.mxu0 %v174_v36  ;;  %v247_v36 = vld [vmem:[#allocation2 + $0x2c8] sm:$0xff] }
  0x3c   :  { %482 = vmatpush.msrb.mxu2 %v288_v38  ;;  %467 = vmatpush.msrb.mxu1 %v225_v46  ;;  %v238_v46 = vld [vmem:[#allocation2 + $0x280] sm:$0xff] }
  0x3d   :  { %429 = vmatpush.msra.mxu3 %v314_v31  ;;  %449 = vmatpush.msrb.mxu0 %v171_v40  ;;  %v253_v31 = vld [vmem:[#allocation2 + $0x2f8] sm:$0xff]  ;;  %v244_v40 = vld [vmem:[#allocation2 + $0x2b0] sm:$0xff] }
  0x3e   :  { %483 = vmatpush.msrb.mxu2 %v285_v47  ;;  %468 = vmatpush.msrb.mxu1 %v222_v50  ;;  %v65_v47 = vperm.slane %v904_v15, 3  ;;  %v235_v50 = vld [vmem:[#allocation2 + $0x268] sm:$0xff]  ;;  %v334_v15 = vld [vmem:[#allocation2 + $0x580] sm:$0xff] }
  0x3f   :  { %430 = vmatpush.msra.mxu3 %v311_v35  ;;  %450 = vmatpush.msrb.mxu0 %v168_v42  ;;  %v187_v35 = vld [vmem:[#allocation2 + $0xe8] sm:$0xff]  ;;  %v181_v42 = vld [vmem:[#allocation2 + $0xb8] sm:$0xff] }
  0x40   :  { %484 = vmatpush.msrb.mxu2 %v282_v51  ;;  %469 = vmatpush.msrb.mxu1 %v219_v54  ;;  %v172_v54 = vld [vmem:[#allocation2 + $0x70] sm:$0xff] }
  0x41   :  { %431 = vmatpush.msra.mxu3 %v308_v39  ;;  %451 = vmatpush.msrb.mxu0 %v165_v45  ;;  %v184_v39 = vld [vmem:[#allocation2 + $0xd0] sm:$0xff]  ;;  %v178_v45 = vld [vmem:[#allocation2 + $0xa0] sm:$0xff] }
  0x42   :  { %485 = vmatpush.msrb.mxu2 %v279_v55  ;;  %470 = vmatpush.msrb.mxu1 %v216_v57  ;;  %v232_v55 = vld [vmem:[#allocation2 + $0x250] sm:$0xff] }
  0x43   :  { %432 = vmatpush.msra.mxu3 %v305_v41  ;;  %452 = vmatpush.msrb.mxu0 %v162_v49  ;;  %v175_v49 = vld [vmem:[#allocation2 + $0x88] sm:$0xff] }
  0x44   :  { %486 = vmatpush.msrb.mxu2 %v276_v58  ;;  %471 = vmatpush.msrb.mxu1 %v213_v60  ;;  %v169_v58 = vld [vmem:[#allocation2 + $0x58] sm:$0xff] }
  0x45   :  { %433 = vmatpush.msra.mxu3 %v302_v43  ;;  %453 = vmatpush.msrb.mxu0 %v159_v53  ;;  %v241_v43 = vld [vmem:[#allocation2 + $0x298] sm:$0xff] }
  0x46   :  { %487 = vmatpush.msrb.mxu2 %v273_v61  ;;  %472 = vmatpush.msrb.mxu1 %v210_v63  ;;  %v289_v60 = vld [vmem:[#allocation2 + $0x418] sm:$0xff]  ;;  %v226_v63 = vld [vmem:[#allocation2 + $0x220] sm:$0xff] }
  0x47   :  { %498 = vmatpush.msrb.mxu3 %v348_v44  ;;  %v301_v44 = vld [vmem:[#allocation2 + $0x478] sm:$0xff] }
  0x48   :  { %488 = vmatpush.msrb.mxu2 %v270_v0  ;;  %473 = vmatpush.msrb.mxu1 %v207_v2  ;;  %v349_v61 = vld [vmem:[#allocation2 + $0x5f8] sm:$0xff]  ;;  %v286_v0 = vld [vmem:[#allocation2 + $0x400] sm:$0xff]  ;;  %v163_v2 = vld [vmem:[#allocation2 + $0x28] sm:$0xff] }
  0x49   :  { %499 = vmatpush.msrb.mxu3 %v345_v48  ;;  %v298_v48 = vld [vmem:[#allocation2 + $0x460] sm:$0xff] }
  0x4a   :  { %489 = vmatpush.msrb.mxu2 %v267_v3  ;;  %v223_v3 = vld [vmem:[#allocation2 + $0x208] sm:$0xff] }
  0x4b   :  { %500 = vmatpush.msrb.mxu3 %v342_v52  ;;  %v295_v52 = vld [vmem:[#allocation2 + $0x448] sm:$0xff] }
  0x4c   :  { %490 = vmatpush.msrb.mxu2 %v264_v5  ;;  %v343_v5 = vld [vmem:[#allocation2 + $0x5c8] sm:$0xff] }
  0x4d   :  { %501 = vmatpush.msrb.mxu3 %v339_v56  ;;  %v292_v56 = vld [vmem:[#allocation2 + $0x430] sm:$0xff] }
  0x4e   :  { %491 = vmatpush.msrb.mxu2 %v261_v7  ;;  %v220_v7 = vld [vmem:[#allocation2 + $0x1f0] sm:$0xff] }
  0x4f   :  { %502 = vmatpush.msrb.mxu3 %v336_v59  ;;  %v229_v59 = vld [vmem:[#allocation2 + $0x238] sm:$0xff] }
  0x50   :  { %492 = vmatpush.msrb.mxu2 %v258_v9  ;;  %v340_v9 = vld [vmem:[#allocation2 + $0x5b0] sm:$0xff] }
  0x51   :  { %503 = vmatpush.msrb.mxu3 %v333_v62  ;;  %v166_v62 = vld [vmem:[#allocation2 + $0x40] sm:$0xff] }
  0x52   :  { %493 = vmatpush.msrb.mxu2 %v255_v11  ;;  %v277_v11 = vld [vmem:[#allocation2 + $0x3b8] sm:$0xff] }
  0x53   :  { %504 = vmatpush.msrb.mxu3 %v330_v1  ;;  %v346_v1 = vld [vmem:[#allocation2 + $0x5e0] sm:$0xff] }
  0x55   :  { %505 = vmatpush.msrb.mxu3 %v327_v4  ;;  %v283_v4 = vld [vmem:[#allocation2 + $0x3e8] sm:$0xff] }
  0x57   :  { %506 = vmatpush.msrb.mxu3 %v324_v6  ;;  %v160_v6 = vld [vmem:[#allocation2 + $0x10] sm:$0xff] }
  0x59   :  { %507 = vmatpush.msrb.mxu3 %v321_v8  ;;  %v280_v8 = vld [vmem:[#allocation2 + $0x3d0] sm:$0xff] }
  0x5b   :  { %508 = vmatpush.msrb.mxu3 %v318_v10  ;;  %v217_v10 = vld [vmem:[#allocation2 + $0x1d8] sm:$0xff] }
  0x5d   :  { %509 = vmatpush.msrb.mxu3 %v315_v12  ;;  %v337_v12 = vld [vmem:[#allocation2 + $0x598] sm:$0xff] }
  0x5f   :  { %510 = vmatpush.msrb.mxu3 %v312_v13  ;;  %v214_v13 = vld [vmem:[#allocation2 + $0x1c0] sm:$0xff] }
  0x61   :  { %511 = vmatpush.msrb.mxu3 %v309_v14  ;;  %v274_v14 = vld [vmem:[#allocation2 + $0x3a0] sm:$0xff] }
  0x63   :  { %512 = vmatpush.msrb.mxu3 %v306_v16  ;;  %v211_v16 = vld [vmem:[#allocation2 + $0x1a8] sm:$0xff] }
  0x65   :  { %513 = vmatpush.msrb.mxu3 %v303_v18  ;;  %v331_v18 = vld [vmem:[#allocation2 + $0x568] sm:$0xff] }
  0x91   :  { %v91_v19 = vpop.f32.mrf.mxu3 }
  0x92   :  { %v92_v20 = vadd.f32 %v91_v19, %v62_v17  ;;  %v271_v17 = vld [vmem:[#allocation2 + $0x388] sm:$0xff]  ;;  %v208_v19 = vld [vmem:[#allocation2 + $0x190] sm:$0xff] }
  0x94   :  { %v907_v21 = vmax.f32 %v92_v20, 0.0  ;;  %v268_v20 = vld [vmem:[#allocation2 + $0x370] sm:$0xff] }
  0x96   :  { %374 = vmatmul.f32.vlgmr.msra.gmra.mxu0 %v907_v21 }
  0x97   :  { %518 = vmatpush.msra.mxu0 %v205_v22  ;;  %v328_v22 = vld [vmem:[#allocation2 + $0x550] sm:$0xff] }
  0x99   :  { %519 = vmatpush.msra.mxu0 %v202_v23  ;;  %v111_v26 = vpop.f32.mrf.mxu3  ;;  %v325_v23 = vld [vmem:[#allocation2 + $0x538] sm:$0xff] }
  0x9a   :  { %v112_v27 = vadd.f32 %v111_v26, %v63_v24  ;;  %v262_v24 = vld [vmem:[#allocation2 + $0x340] sm:$0xff]  ;;  %v259_v26 = vld [vmem:[#allocation2 + $0x328] sm:$0xff] }
  0x9b   :  { %520 = vmatpush.msra.mxu0 %v199_v25  ;;  %v322_v25 = vld [vmem:[#allocation2 + $0x520] sm:$0xff] }
  0x9c   :  { %v911_v29 = vmax.f32 %v112_v27, 0.0  ;;  %v319_v27 = vld [vmem:[#allocation2 + $0x508] sm:$0xff] }
  0x9d   :  { %521 = vmatpush.msra.mxu0 %v196_v28  ;;  %v256_v28 = vld [vmem:[#allocation2 + $0x310] sm:$0xff] }
  0x9e   :  { %394 = vmatmul.f32.vlgmr.msra.gmra.mxu1 %v911_v29  ;;  %454 = vmatmul.f32.vlgmr.msrb.gmra.mxu0 %v907_v21 }
  0x9f   :  { %522 = vmatpush.msra.mxu0 %v193_v30  ;;  %538 = vmatpush.msra.mxu1 %v253_v31  ;;  %v316_v30 = vld [vmem:[#allocation2 + $0x4f0] sm:$0xff]  ;;  %v313_v31 = vld [vmem:[#allocation2 + $0x4d8] sm:$0xff] }
  0xa1   :  { %523 = vmatpush.msra.mxu0 %v190_v32  ;;  %539 = vmatpush.msra.mxu1 %v250_v33  ;;  %v131_v37 = vpop.f32.mrf.mxu3  ;;  %v310_v32 = vld [vmem:[#allocation2 + $0x4c0] sm:$0xff]  ;;  %v304_v33 = vld [vmem:[#allocation2 + $0x490] sm:$0xff] }
  0xa2   :  { %v132_v38 = vadd.f32 %v131_v37, %v64_v34  ;;  %v616_v34 = vld [vmem:[%s1088_s5 + $0x78] sm:$0xff]  ;;  %v613_v37 = vld [vmem:[%s1088_s5 + $0x60] sm:$0xff] }
  0xa3   :  { %524 = vmatpush.msra.mxu0 %v187_v35  ;;  %540 = vmatpush.msra.mxu1 %v247_v36  ;;  %v615_v35 = vld [vmem:[%s1088_s5 + $0x70] sm:$0xff]  ;;  %v614_v36 = vld [vmem:[%s1088_s5 + $0x68] sm:$0xff] }
  0xa4   :  { %v916_v41 = vmax.f32 %v132_v38, 0.0  ;;  %v632_v38 = vld [vmem:[%s1088_s5 + $0xf8] sm:$0xff] }
  0xa5   :  { %525 = vmatpush.msra.mxu0 %v184_v39  ;;  %541 = vmatpush.msra.mxu1 %v244_v40  ;;  %v631_v39 = vld [vmem:[%s1088_s5 + $0xf0] sm:$0xff]  ;;  %v612_v40 = vld [vmem:[%s1088_s5 + $0x58] sm:$0xff] }
  0xa6   :  { %414 = vmatmul.f32.vlgmr.msra.gmra.mxu2 %v916_v41  ;;  %474 = vmatmul.f32.vlgmr.msrb.gmra.mxu1 %v911_v29 }
  0xa7   :  { %526 = vmatpush.msra.mxu0 %v181_v42  ;;  %542 = vmatpush.msra.mxu1 %v241_v43  ;;  %v610_v42 = vld [vmem:[%s1088_s5 + $0x48] sm:$0xff] }
  0xa8   :  { %558 = vmatpush.msra.mxu2 %v301_v44  ;;  %v630_v43 = vld [vmem:[%s1088_s5 + $0xe8] sm:$0xff]  ;;  %v609_v44 = vld [vmem:[%s1088_s5 + $0x40] sm:$0xff] }
  0xa9   :  { %527 = vmatpush.msra.mxu0 %v178_v45  ;;  %543 = vmatpush.msra.mxu1 %v238_v46  ;;  %v151_v51 = vpop.f32.mrf.mxu3  ;;  %v629_v45 = vld [vmem:[%s1088_s5 + $0xe0] sm:$0xff]  ;;  %v608_v46 = vld [vmem:[%s1088_s5 + $0x38] sm:$0xff] }
  0xaa   :  { %559 = vmatpush.msra.mxu2 %v298_v48  ;;  %v152_v53 = vadd.f32 %v151_v51, %v65_v47  ;;  %v628_v47 = vld [vmem:[%s1088_s5 + $0xd8] sm:$0xff]  ;;  %v607_v48 = vld [vmem:[%s1088_s5 + $0x30] sm:$0xff]  ;;  %v626_v51 = vld [vmem:[%s1088_s5 + $0xc8] sm:$0xff] }
  0xab   :  { %528 = vmatpush.msra.mxu0 %v175_v49  ;;  %544 = vmatpush.msra.mxu1 %v235_v50  ;;  %v627_v49 = vld [vmem:[%s1088_s5 + $0xd0] sm:$0xff]  ;;  %v606_v50 = vld [vmem:[%s1088_s5 + $0x28] sm:$0xff] }
  0xac   :  { %v921_v57 = vmax.f32 %v152_v53, 0.0  ;;  %560 = vmatpush.msra.mxu2 %v295_v52  ;;  %v605_v52 = vld [vmem:[%s1088_s5 + $0x20] sm:$0xff] }
  0xad   :  { %529 = vmatpush.msra.mxu0 %v172_v54  ;;  %545 = vmatpush.msra.mxu1 %v232_v55  ;;  %v625_v53 = vld [vmem:[%s1088_s5 + $0xc0] sm:$0xff]  ;;  %v604_v54 = vld [vmem:[%s1088_s5 + $0x18] sm:$0xff] }
  0xae   :  { %561 = vmatpush.msra.mxu2 %v292_v56  ;;  %434 = vmatmul.f32.vlgmr.msra.gmra.mxu3 %v921_v57  ;;  %v624_v55 = vld [vmem:[%s1088_s5 + $0xb8] sm:$0xff]  ;;  %v603_v56 = vld [vmem:[%s1088_s5 + $0x10] sm:$0xff] }
  0xaf   :  { %494 = vmatmul.f32.vlgmr.msrb.gmra.mxu2 %v916_v41  ;;  %530 = vmatpush.msra.mxu0 %v169_v58  ;;  %v602_v58 = vld [vmem:[%s1088_s5 + $0x8] sm:$0xff] }
  0xb0   :  { %546 = vmatpush.msra.mxu1 %v229_v59  ;;  %562 = vmatpush.msra.mxu2 %v289_v60  ;;  %v622_v59 = vld [vmem:[%s1088_s5 + $0xa8] sm:$0xff]  ;;  %v601_v60 = vld [vmem:[%s1088_s5] sm:$0xff] }
  0xb1   :  { %578 = vmatpush.msra.mxu3 %v349_v61  ;;  %531 = vmatpush.msra.mxu0 %v166_v62  ;;  %v621_v61 = vld [vmem:[%s1088_s5 + $0xa0] sm:$0xff]  ;;  %v648_v62 = vld [vmem:[%s1088_s5 + $0x178] sm:$0xff] }
  0xb2   :  { %547 = vmatpush.msra.mxu1 %v226_v63  ;;  %563 = vmatpush.msra.mxu2 %v286_v0  ;;  %v620_v63 = vld [vmem:[%s1088_s5 + $0x98] sm:$0xff]  ;;  %v647_v0 = vld [vmem:[%s1088_s5 + $0x170] sm:$0xff] }
  0xb3   :  { %579 = vmatpush.msra.mxu3 %v346_v1  ;;  %532 = vmatpush.msra.mxu0 %v163_v2  ;;  %v619_v1 = vld [vmem:[%s1088_s5 + $0x90] sm:$0xff]  ;;  %v646_v2 = vld [vmem:[%s1088_s5 + $0x168] sm:$0xff] }
  0xb4   :  { %548 = vmatpush.msra.mxu1 %v223_v3  ;;  %564 = vmatpush.msra.mxu2 %v283_v4  ;;  %v618_v3 = vld [vmem:[%s1088_s5 + $0x88] sm:$0xff]  ;;  %v645_v4 = vld [vmem:[%s1088_s5 + $0x160] sm:$0xff] }
  0xb5   :  { %580 = vmatpush.msra.mxu3 %v343_v5  ;;  %533 = vmatpush.msra.mxu0 %v160_v6  ;;  %v617_v5 = vld [vmem:[%s1088_s5 + $0x80] sm:$0xff]  ;;  %v644_v6 = vld [vmem:[%s1088_s5 + $0x158] sm:$0xff] }
  0xb6   :  { %549 = vmatpush.msra.mxu1 %v220_v7  ;;  %565 = vmatpush.msra.mxu2 %v280_v8  ;;  %v643_v7 = vld [vmem:[%s1088_s5 + $0x150] sm:$0xff]  ;;  %v642_v8 = vld [vmem:[%s1088_s5 + $0x148] sm:$0xff] }
  0xb7   :  { %581 = vmatpush.msra.mxu3 %v340_v9  ;;  %534 = vmatmul.f32.vlgmr.msra.gmra.mxu0 %v907_v21  ;;  %v265_v21 = vld [vmem:[#allocation2 + $0x358] sm:$0xff]  ;;  %v641_v9 = vld [vmem:[%s1088_s5 + $0x140] sm:$0xff] }
  0xb8   :  { %514 = vmatmul.f32.vlgmr.msrb.gmra.mxu3 %v921_v57  ;;  %550 = vmatpush.msra.mxu1 %v217_v10  ;;  %v350_v10 = vld [vmem:[%s1087_s4] sm:$0x7] }
  0xb9   :  { %566 = vmatpush.msra.mxu2 %v277_v11  ;;  %582 = vmatpush.msra.mxu3 %v337_v12  ;;  %v640_v11 = vld [vmem:[%s1088_s5 + $0x138] sm:$0xff]  ;;  %v352_v12 = vperm.slane %v350_v10, 0 }
  0xba   :  { %551 = vmatpush.msra.mxu1 %v214_v13  ;;  %653 = vmatpush.msrb.mxu0 %v616_v34 }
  0xbb   :  { %567 = vmatpush.msra.mxu2 %v274_v14  ;;  %583 = vmatpush.msra.mxu3 %v334_v15  ;;  %v639_v14 = vld [vmem:[%s1088_s5 + $0x130] sm:$0xff] }
  0xbc   :  { %552 = vmatpush.msra.mxu1 %v211_v16  ;;  %654 = vmatpush.msrb.mxu0 %v615_v35 }
  0xbd   :  { %568 = vmatpush.msra.mxu2 %v271_v17  ;;  %584 = vmatpush.msra.mxu3 %v331_v18  ;;  %v638_v17 = vld [vmem:[%s1088_s5 + $0x128] sm:$0xff]  ;;  %v637_v18 = vld [vmem:[%s1088_s5 + $0x120] sm:$0xff] }
  0xbe   :  { %553 = vmatpush.msra.mxu1 %v208_v19  ;;  %655 = vmatpush.msrb.mxu0 %v614_v36 }
  0xbf   :  { %569 = vmatpush.msra.mxu2 %v268_v20  ;;  %585 = vmatpush.msra.mxu3 %v328_v22  ;;  %v636_v22 = vld [vmem:[%s1088_s5 + $0x118] sm:$0xff] }
  0xc0   :  { %554 = vmatmul.f32.vlgmr.msra.gmra.mxu1 %v911_v29  ;;  %v307_v29 = vld [vmem:[#allocation2 + $0x4a8] sm:$0xff]  ;;  %656 = vmatpush.msrb.mxu0 %v613_v37 }
  0xc1   :  { %570 = vmatpush.msra.mxu2 %v265_v21  ;;  %586 = vmatpush.msra.mxu3 %v325_v23 }
  0xc2   :  { %673 = vmatpush.msrb.mxu1 %v632_v38  ;;  %657 = vmatpush.msrb.mxu0 %v612_v40 }
  0xc3   :  { %571 = vmatpush.msra.mxu2 %v262_v24  ;;  %587 = vmatpush.msra.mxu3 %v322_v25  ;;  %v353_v24 = vperm.slane %v350_v10, 1 }
  0xc4   :  { %674 = vmatpush.msrb.mxu1 %v631_v39  ;;  %v354_v39 = vperm.slane %v350_v10, 2 }
  0xc5   :  { %572 = vmatpush.msra.mxu2 %v259_v26  ;;  %588 = vmatpush.msra.mxu3 %v319_v27  ;;  %v635_v26 = vld [vmem:[%s1088_s5 + $0x110] sm:$0xff] }
  0xc6   :  { %675 = vmatpush.msrb.mxu1 %v630_v43 }
  0xc7   :  { %573 = vmatpush.msra.mxu2 %v256_v28  ;;  %589 = vmatpush.msra.mxu3 %v316_v30  ;;  %v634_v30 = vld [vmem:[%s1088_s5 + $0x108] sm:$0xff] }
  0xc8   :  { %574 = vmatmul.f32.vlgmr.msra.gmra.mxu2 %v916_v41  ;;  %v611_v41 = vld [vmem:[%s1088_s5 + $0x50] sm:$0xff]  ;;  %676 = vmatpush.msrb.mxu1 %v629_v45 }
  0xc9   :  { %590 = vmatpush.msra.mxu3 %v313_v31  ;;  %658 = vmatpush.msrb.mxu0 %v611_v41 }
  0xca   :  { %677 = vmatpush.msrb.mxu1 %v628_v47  ;;  %693 = vmatpush.msrb.mxu2 %v648_v62 }
  0xcb   :  { %591 = vmatpush.msra.mxu3 %v310_v32  ;;  %659 = vmatpush.msrb.mxu0 %v610_v42 }
  0xcc   :  { %678 = vmatpush.msrb.mxu1 %v627_v49  ;;  %694 = vmatpush.msrb.mxu2 %v647_v0  ;;  %v740_v49 = vld [vmem:[%s1089_s6] ss:$0 sm:$0xff] }
  0xcd   :  { %592 = vmatpush.msra.mxu3 %v307_v29  ;;  %660 = vmatpush.msrb.mxu0 %v609_v44  ;;  %v633_v29 = vld [vmem:[%s1088_s5 + $0x100] sm:$0xff] }
  0xce   :  { %679 = vmatpush.msrb.mxu1 %v626_v51  ;;  %695 = vmatpush.msrb.mxu2 %v646_v2 }
  0xcf   :  { %593 = vmatpush.msra.mxu3 %v304_v33  ;;  %661 = vmatpush.msrb.mxu0 %v608_v46 }
  0xd0   :  { %594 = vmatmul.f32.vlgmr.msra.gmra.mxu3 %v921_v57  ;;  %680 = vmatpush.msrb.mxu1 %v625_v53  ;;  %v623_v57 = vld [vmem:[%s1088_s5 + $0xb0] sm:$0xff] }
  0xd1   :  { %662 = vmatpush.msrb.mxu0 %v607_v48  ;;  %696 = vmatpush.msrb.mxu2 %v645_v4 }
  0xd2   :  { %681 = vmatpush.msrb.mxu1 %v624_v55 }
  0xd3   :  { %663 = vmatpush.msrb.mxu0 %v606_v50  ;;  %697 = vmatpush.msrb.mxu2 %v644_v6 }
  0xd4   :  { %682 = vmatpush.msrb.mxu1 %v623_v57 }
  0xd5   :  { %664 = vmatpush.msrb.mxu0 %v605_v52  ;;  %698 = vmatpush.msrb.mxu2 %v643_v7 }
  0xd6   :  { %683 = vmatpush.msrb.mxu1 %v622_v59 }
  0xd7   :  { %665 = vmatpush.msrb.mxu0 %v604_v54  ;;  %699 = vmatpush.msrb.mxu2 %v642_v8 }
  0xd8   :  { %684 = vmatpush.msrb.mxu1 %v621_v61 }
  0xd9   :  { %666 = vmatpush.msrb.mxu0 %v603_v56  ;;  %700 = vmatpush.msrb.mxu2 %v641_v9 }
  0xda   :  { %685 = vmatpush.msrb.mxu1 %v620_v63 }
  0xdb   :  { %667 = vmatpush.msrb.mxu0 %v602_v58  ;;  %701 = vmatpush.msrb.mxu2 %v640_v11 }
  0xdc   :  { %686 = vmatpush.msrb.mxu1 %v619_v1 }
  0xdd   :  { %668 = vmatpush.msrb.mxu0 %v601_v60  ;;  %702 = vmatpush.msrb.mxu2 %v639_v14 }
  0xde   :  { %687 = vmatpush.msrb.mxu1 %v618_v3 }
  0xdf   :  { %703 = vmatpush.msrb.mxu2 %v638_v17 }
  0xe0   :  { %688 = vmatpush.msrb.mxu1 %v617_v5 }
  0xe1   :  { %704 = vmatpush.msrb.mxu2 %v637_v18 }
  0xe3   :  { %705 = vmatpush.msrb.mxu2 %v636_v22 }
  0xe5   :  { %706 = vmatpush.msrb.mxu2 %v635_v26 }
  0xe7   :  { %707 = vmatpush.msrb.mxu2 %v634_v30 }
  0xe9   :  { %708 = vmatpush.msrb.mxu2 %v633_v29 }
 0x113   :  { %v375_v13 = vpop.f32.mrf.mxu0 }
 0x114   :  { %v376_v16 = vadd.f32 %v375_v13, %v352_v12 }
 0x11b   :  { %v395_v15 = vpop.f32.mrf.mxu1  ;;  %v455_v27 = vpop.f32.mrf.mxu0 }
 0x11c   :  { %v396_v20 = vadd.f32 %v395_v15, %v376_v16  ;;  %v456_v32 = vadd.f32 %v455_v27, %v353_v24 }
 0x123   :  { %v475_v31 = vpop.f32.mrf.mxu1 }
 0x124   :  { %v476_v34 = vadd.f32 %v475_v31, %v456_v32 }
 0x129   :  { %v415_v19 = vpop.f32.mrf.mxu2 }
 0x12a   :  { %v416_v21 = vadd.f32 %v415_v19, %v396_v20 }
 0x131   :  { %v435_v23 = vpop.f32.mrf.mxu3 }
 0x132   :  { %v436_v25 = vadd.f32 %v435_v23, %v416_v21  ;;  %v495_v33 = vpop.f32.mrf.mxu2 }
 0x133   :  { %v496_v35 = vadd.f32 %v495_v33, %v476_v34 }
 0x134   :  { %v598_v28 = vmax.f32 %v436_v25, 0.0  ;;  %v535_v40 = vpop.f32.mrf.mxu0 }
 0x135   :  { %v536_v42 = vadd.f32 %v535_v40, %v354_v39 }
 0x136   :  { %669 = vmatmul.f32.vlgmr.msrb.gmra.mxu0 %v598_v28 }
 0x13b   :  { %v515_v36 = vpop.f32.mrf.mxu3 }
 0x13c   :  { %v516_v37 = vadd.f32 %v515_v36, %v496_v35 }
 0x13d   :  { %v555_v41 = vpop.f32.mrf.mxu1 }
 0x13e   :  { %v599_v38 = vmax.f32 %v516_v37, 0.0  ;;  %v556_v44 = vadd.f32 %v555_v41, %v536_v42 }
 0x140   :  { %689 = vmatmul.f32.vlgmr.msrb.gmra.mxu1 %v599_v38 }
 0x14b   :  { %v575_v43 = vpop.f32.mrf.mxu2 }
 0x14c   :  { %v576_v45 = vadd.f32 %v575_v43, %v556_v44 }
 0x153   :  { %v595_v46 = vpop.f32.mrf.mxu3 }
 0x154   :  { %v596_v47 = vadd.f32 %v595_v46, %v576_v45 }
 0x156   :  { %v600_v48 = vmax.f32 %v596_v47, 0.0 }
 0x158   :  { %709 = vmatmul.f32.vlgmr.msrb.gmra.mxu2 %v600_v48 }
 0x1b3   :  { %v670_v50 = vpop.f32.mrf.mxu0 }
 0x1b4   :  { %v671_v52 = vadd.f32 %v740_v49, %v670_v50 }
 0x1bd   :  { %v690_v51 = vpop.f32.mrf.mxu1 }
 0x1be   :  { %v691_v53 = vadd.f32 %v690_v51, %v671_v52 }
 0x1db   :  { %v710_v54 = vpop.f32.mrf.mxu2 }
 0x1dc   :  { %v711_v55 = vadd.f32 %v710_v54, %v691_v53 }
 0x1de   :  { %714 = vst.msk [vmem:[#allocation5] sm:$0xff] %vm713_vm1, %v711_v55 }
 0x1df   :  { %725 = dma.vmem_to_hbm [thread:$0]  %s721_s10, 128, %s723_s3, [#allocation4]  }
 0x1e0   :  { %791 = dma.done.wait [#allocation4], 128  }
 0x1e1   :  { %792 = vsyncadd [#allocation4], 4294967168 }
 0x1e2   :  { %730 = vsyncpa [#allocation3], 1 }
 0x1e3   :  { %731 = vsyncpa [#allocation4], 1 }

</bundles_post_ra>
